<compile_context>
chip_gen: v7x
topology: tpu7x:2x2x1
jax: 0.10.0
libtpu: 0.0.40
codegen_flags: <defaults>
</compile_context>

<pallas_src>
import jax
import jax.numpy as jnp
from jax.experimental import pallas as pl
from jax.experimental.pallas import tpu as pltpu

FEATURES = 13
H1 = 30
H2 = 16
OUT = 1

# Default batch tile (lanes). Tiles are tiny (a (16, 2048) f32 tile ~128 KiB,
# double-buffered), so this fits comfortably in scoped VMEM on v5e/v6e/v7x.
DEFAULT_TB = 2048


def _round_up(n, m):
    return ((n + m - 1) // m) * m


def _mlp_kernel(x_ref, w1_ref, b1_ref, w2_ref, b2_ref, w3_ref, b3_ref, o_ref):
    # x_ref: (13, TB)  -- batch on lanes, features on sublanes.
    x = x_ref[...]

    # fc1 + swish: (30, 13) @ (13, TB) -> (30, TB)
    h1 = jnp.dot(w1_ref[...], x, preferred_element_type=jnp.float32) + b1_ref[...]
    h1 = h1 * jnp.maximum(h1, 0.0)          # swish(x) = x * relu(x) (source def)

    # Dropout1d(p=0.25): identity in eval/inference mode.
    # TODO(synk): training-mode channel dropout (random masking) not implemented.

    # fc2 + swish: (16, 30) @ (30, TB) -> (16, TB)
    h2 = jnp.dot(w2_ref[...], h1, preferred_element_type=jnp.float32) + b2_ref[...]
    h2 = h2 * jnp.maximum(h2, 0.0)

    # fc3 (K=16, N=1): VPU broadcast-MAC + sublane reduction instead of MXU.
    # (16, 1) * (16, TB) -> sum over sublanes -> (1, TB)
    h3 = jnp.sum(w3_ref[...] * h2, axis=0, keepdims=True) + b3_ref[...]

    # sigmoid; exp and the (exact) reciprocal ride the EUP slot.
    o_ref[...] = pl.reciprocal(1.0 + jnp.exp(-h3))


def mlp_forward(x, params, tb=None):
    """x: (B, 13) float32 -> (B, 1) float32.

    params are PyTorch-shaped: w (out_features, in_features), b (out_features,).
    """
    w1, b1, w2, b2, w3, b3 = params
    B = x.shape[0]

    if tb is None:
        # Large tiles amortize the ~0.35 us per-grid-step overhead; for tiny
        # demo batches just use one 128-wide tile.
        tb = min(DEFAULT_TB, _round_up(B, 128))
    b_pad = _round_up(B, tb)
    grid = (b_pad // tb,)

    # Pad the batch and put it on the lane axis.
    x_t = jnp.pad(x, ((0, b_pad - B), (0, 0))).T            # (13, B_pad)

    # Column-vector biases / fc3 weight column for the transposed layout.
    b1c = b1.reshape(H1, OUT if False else 1)                # (30, 1)
    b2c = b2.reshape(H2, 1)                                  # (16, 1)
    w3c = w3.T                                               # (16, 1)
    b3c = b3.reshape(OUT, 1)                                 # (1, 1)

    const = lambda shape: pl.BlockSpec(shape, lambda i: (0,) * len(shape))

    y_t = pl.pallas_call(
        _mlp_kernel,
        out_shape=jax.ShapeDtypeStruct((OUT, b_pad), jnp.float32),
        grid=grid,
        in_specs=[
            pl.BlockSpec((FEATURES, tb), lambda i: (0, i)),   # x tile (streamed)
            const(w1.shape),                                  # (30, 13) resident
            const((H1, 1)),
            const(w2.shape),                                  # (16, 30) resident
            const((H2, 1)),
            const((H2, 1)),                                   # fc3 weight column
            const((OUT, 1)),
        ],
        out_specs=pl.BlockSpec((OUT, tb), lambda i: (0, i)),
        compiler_params=pltpu.CompilerParams(
            dimension_semantics=("parallel",),
        ),
    )(x_t, w1, b1c, w2, b2c, w3c, b3c)

    return y_t[:, :B].T                                      # (B, 1)


def init_params(key):
    """Deterministic init mimicking torch.nn.Linear (uniform +-1/sqrt(fan_in)).
    Weights stored PyTorch-style: (out_features, in_features)."""
    ks = jax.random.split(key, 6)

    def linear(kw, kb, fan_in, fan_out):
        bound = 1.0 / jnp.sqrt(jnp.float32(fan_in))
        w = jax.random.uniform(kw, (fan_out, fan_in), jnp.float32, -bound, bound)
        b = jax.random.uniform(kb, (fan_out,), jnp.float32, -bound, bound)
        return w, b

    w1, b1 = linear(ks[0], ks[1], FEATURES, H1)
    w2, b2 = linear(ks[2], ks[3], H1, H2)
    w3, b3 = linear(ks[4], ks[5], H2, OUT)
    return (w1, b1, w2, b2, w3, b3)


def _reference(x, params):
    w1, b1, w2, b2, w3, b3 = params
    h1 = x @ w1.T + b1
    h1 = h1 * jnp.maximum(h1, 0.0)
    h2 = h1 @ w2.T + b2
    h2 = h2 * jnp.maximum(h2, 0.0)
    return jax.nn.sigmoid(h2 @ w3.T + b3)


if __name__ == "__main__":
    key = jax.random.PRNGKey(0)
    k_x, k_x2, k_p = jax.random.split(key, 3)
    params = init_params(k_p)

    # Small demo batch (note: for such tiny B the pallas_call fixed cost
    # dominates; the tiling/layout work pays off at large B).
    B = 8
    x = jax.random.normal(k_x, (B, FEATURES), dtype=jnp.float32)
    y = jax.block_until_ready(mlp_forward(x, params))
    assert y.shape == (B, OUT)
    assert jnp.allclose(y, _reference(x, params), atol=1e-5, rtol=1e-5)

    # Exercise multi-step batch tiling + ragged tail (B not divisible by tb).
    B2 = 300
    x2 = jax.random.normal(k_x2, (B2, FEATURES), dtype=jnp.float32)
    y2 = jax.block_until_ready(mlp_forward(x2, params, tb=128))
    assert y2.shape == (B2, OUT)
    assert jnp.allclose(y2, _reference(x2, params), atol=1e-5, rtol=1e-5)

    print("KERNEL_OK")
</pallas_src>

<mosaic_0001>
module attributes {stable_mosaic.version = 11 : i64} {
  func.func @_mlp_kernel(%arg0: i32, %arg1: memref<13x128xf32, #tpu.memory_space<vmem>>, %arg2: memref<30x13xf32, #tpu.memory_space<vmem>>, %arg3: memref<30x1xf32, #tpu.memory_space<vmem>>, %arg4: memref<16x30xf32, #tpu.memory_space<vmem>>, %arg5: memref<16x1xf32, #tpu.memory_space<vmem>>, %arg6: memref<16x1xf32, #tpu.memory_space<vmem>>, %arg7: memref<1x1xf32, #tpu.memory_space<vmem>>, %arg8: memref<1x128xf32, #tpu.memory_space<vmem>>) attributes {dimension_semantics = [#tpu.dimension_semantics<parallel>], iteration_bounds = array<i64: 1>, scalar_prefetch = 0 : i64, scratch_operands = 0 : i64, tpu.core_type = #tpu.core_type<tc>, window_params = [{transform_indices = @transform_0, window_bounds = array<i64: 13, 128>}, {pipeline_mode = #tpu.pipeline_mode<synchronous>, transform_indices = @transform_1, window_bounds = array<i64: 30, 13>}, {pipeline_mode = #tpu.pipeline_mode<synchronous>, transform_indices = @transform_2, window_bounds = array<i64: 30, 1>}, {pipeline_mode = #tpu.pipeline_mode<synchronous>, transform_indices = @transform_3, window_bounds = array<i64: 16, 30>}, {pipeline_mode = #tpu.pipeline_mode<synchronous>, transform_indices = @transform_4, window_bounds = array<i64: 16, 1>}, {pipeline_mode = #tpu.pipeline_mode<synchronous>, transform_indices = @transform_5, window_bounds = array<i64: 16, 1>}, {pipeline_mode = #tpu.pipeline_mode<synchronous>, transform_indices = @transform_6, window_bounds = array<i64: 1, 1>}, {transform_indices = @transform_7, window_bounds = array<i64: 1, 128>}]} {
    %c0 = arith.constant 0 : index
    %c0_0 = arith.constant 0 : index
    %0 = vector.load %arg1[%c0, %c0_0] : memref<13x128xf32, #tpu.memory_space<vmem>>, vector<13x128xf32>
    %c0_1 = arith.constant 0 : index
    %c0_2 = arith.constant 0 : index
    %1 = vector.load %arg2[%c0_1, %c0_2] : memref<30x13xf32, #tpu.memory_space<vmem>>, vector<30x13xf32>
    %cst = arith.constant dense<0.000000e+00> : vector<30x128xf32>
    %2 = tpu.matmul %1, %0, %cst {dimension_numbers = #tpu.dot_dimension_numbers<[1], [0], [0], [1], [0, 0, 1, 1], [], []>} : vector<30x13xf32>, vector<13x128xf32>, vector<30x128xf32> -> vector<30x128xf32>
    %c0_3 = arith.constant 0 : index
    %c0_4 = arith.constant 0 : index
    %3 = vector.load %arg3[%c0_3, %c0_4] : memref<30x1xf32, #tpu.memory_space<vmem>>, vector<30x1xf32>
    %4 = vector.broadcast %3 : vector<30x1xf32> to vector<30x128xf32>
    %5 = arith.addf %2, %4 : vector<30x128xf32>
    %cst_5 = arith.constant 0.000000e+00 : f32
    %6 = vector.broadcast %cst_5 : f32 to vector<30x128xf32>
    %7 = arith.maximumf %5, %6 : vector<30x128xf32>
    %8 = arith.mulf %5, %7 : vector<30x128xf32>
    %c0_6 = arith.constant 0 : index
    %c0_7 = arith.constant 0 : index
    %9 = vector.load %arg4[%c0_6, %c0_7] : memref<16x30xf32, #tpu.memory_space<vmem>>, vector<16x30xf32>
    %cst_8 = arith.constant dense<0.000000e+00> : vector<16x128xf32>
    %10 = tpu.matmul %9, %8, %cst_8 {dimension_numbers = #tpu.dot_dimension_numbers<[1], [0], [0], [1], [0, 0, 1, 1], [], []>} : vector<16x30xf32>, vector<30x128xf32>, vector<16x128xf32> -> vector<16x128xf32>
    %c0_9 = arith.constant 0 : index
    %c0_10 = arith.constant 0 : index
    %11 = vector.load %arg5[%c0_9, %c0_10] : memref<16x1xf32, #tpu.memory_space<vmem>>, vector<16x1xf32>
    %12 = vector.broadcast %11 : vector<16x1xf32> to vector<16x128xf32>
    %13 = arith.addf %10, %12 : vector<16x128xf32>
    %cst_11 = arith.constant 0.000000e+00 : f32
    %14 = vector.broadcast %cst_11 : f32 to vector<16x128xf32>
    %15 = arith.maximumf %13, %14 : vector<16x128xf32>
    %16 = arith.mulf %13, %15 : vector<16x128xf32>
    %c0_12 = arith.constant 0 : index
    %c0_13 = arith.constant 0 : index
    %17 = vector.load %arg6[%c0_12, %c0_13] : memref<16x1xf32, #tpu.memory_space<vmem>>, vector<16x1xf32>
    %18 = vector.broadcast %17 : vector<16x1xf32> to vector<16x128xf32>
    %19 = arith.mulf %18, %16 : vector<16x128xf32>
    %cst_14 = arith.constant dense<0.000000e+00> : vector<128xf32>
    %20 = vector.multi_reduction <add>, %19, %cst_14 [0] : vector<16x128xf32> to vector<128xf32>
    %21 = vector.shape_cast %20 : vector<128xf32> to vector<1x128xf32>
    %c0_15 = arith.constant 0 : index
    %c0_16 = arith.constant 0 : index
    %22 = vector.load %arg7[%c0_15, %c0_16] : memref<1x1xf32, #tpu.memory_space<vmem>>, vector<1x1xf32>
    %23 = vector.broadcast %22 : vector<1x1xf32> to vector<1x128xf32>
    %24 = arith.addf %21, %23 : vector<1x128xf32>
    %cst_17 = arith.constant 0.000000e+00 : f32
    %25 = vector.broadcast %cst_17 : f32 to vector<1x128xf32>
    %26 = arith.subf %25, %24 : vector<1x128xf32>
    %27 = math.exp %26 : vector<1x128xf32>
    %cst_18 = arith.constant 1.000000e+00 : f32
    %28 = vector.broadcast %cst_18 : f32 to vector<1x128xf32>
    %29 = arith.addf %28, %27 : vector<1x128xf32>
    %30 = tpu.reciprocal %29 : vector<1x128xf32> -> vector<1x128xf32>
    %c0_19 = arith.constant 0 : index
    %c0_20 = arith.constant 0 : index
    %31 = vector.load %arg8[%c0_19, %c0_20] : memref<1x128xf32, #tpu.memory_space<vmem>>, vector<1x128xf32>
    tpu.vector_store %arg8[%c0_19, %c0_20], %30 {strides = array<i32>} : memref<1x128xf32, #tpu.memory_space<vmem>>, vector<1x128xf32>,
    return
  }
  func.func @transform_0(%arg0: i32) -> (i32, i32) {
    %c0_i32 = arith.constant 0 : i32
    %c0_i32_0 = arith.constant 0 : i32
    return %c0_i32, %arg0 : i32, i32
  }
  func.func @transform_1(%arg0: i32) -> (i32, i32) {
    %c0_i32 = arith.constant 0 : i32
    %c0_i32_0 = arith.constant 0 : i32
    %c0_i32_1 = arith.constant 0 : i32
    return %c0_i32, %c0_i32_0 : i32, i32
  }
  func.func @transform_2(%arg0: i32) -> (i32, i32) {
    %c0_i32 = arith.constant 0 : i32
    %c0_i32_0 = arith.constant 0 : i32
    %c0_i32_1 = arith.constant 0 : i32
    return %c0_i32, %c0_i32_0 : i32, i32
  }
  func.func @transform_3(%arg0: i32) -> (i32, i32) {
    %c0_i32 = arith.constant 0 : i32
    %c0_i32_0 = arith.constant 0 : i32
    %c0_i32_1 = arith.constant 0 : i32
    return %c0_i32, %c0_i32_0 : i32, i32
  }
  func.func @transform_4(%arg0: i32) -> (i32, i32) {
    %c0_i32 = arith.constant 0 : i32
    %c0_i32_0 = arith.constant 0 : i32
    %c0_i32_1 = arith.constant 0 : i32
    return %c0_i32, %c0_i32_0 : i32, i32
  }
  func.func @transform_5(%arg0: i32) -> (i32, i32) {
    %c0_i32 = arith.constant 0 : i32
    %c0_i32_0 = arith.constant 0 : i32
    %c0_i32_1 = arith.constant 0 : i32
    return %c0_i32, %c0_i32_0 : i32, i32
  }
  func.func @transform_6(%arg0: i32) -> (i32, i32) {
    %c0_i32 = arith.constant 0 : i32
    %c0_i32_0 = arith.constant 0 : i32
    %c0_i32_1 = arith.constant 0 : i32
    return %c0_i32, %c0_i32_0 : i32, i32
  }
  func.func @transform_7(%arg0: i32) -> (i32, i32) {
    %c0_i32 = arith.constant 0 : i32
    %c0_i32_0 = arith.constant 0 : i32
    return %c0_i32, %arg0 : i32, i32
  }
}

</mosaic_0001>

<bundles_post_ra>
// kernel: tpu_custom_call.1
= control target key start
LH: loop header
LB: loop body
LE: loop exit
PB: predicated region body
PF: predicated region fallthrough
CT: control target
= control target key end

     0   :  { %s529_s0 = inlined_call_operand.vmem [shape: f32[13,128], index: 0, kind: input, shape index: {}]   ;;  %s530_s1 = inlined_call_operand.vmem [shape: f32[30,13], index: 1, kind: input, shape index: {}]   ;;  %s531_s2 = inlined_call_operand.vmem [shape: f32[30,1], index: 2, kind: input, shape index: {}]   ;;  %s532_s3 = inlined_call_operand.vmem [shape: f32[16,30], index: 3, kind: input, shape index: {}]   ;;  %s533_s4 = inlined_call_operand.vmem [shape: f32[16,1], index: 4, kind: input, shape index: {}]   ;;  %s534_s5 = inlined_call_operand.vmem [shape: f32[16,1], index: 5, kind: input, shape index: {}]   ;;  %s535_s6 = inlined_call_operand.<no memory space> [shape: f32[1,1], index: 6, kind: input, shape index: {}]   ;;  %s536_s7 = inlined_call_operand.hbm [shape: f32[1,128], index: 7, kind: output, shape index: {}]  }
   0x1   :  { %v12_v0 = vstv %s535_s6 }
   0x2   :  { %13 = vst [vmem:[#allocation2] sm:$0x1] %v12_v0 }
   0x3   :  { %v29_v1 = vld [vmem:[%s529_s0] sm:$0xff]  ;;  %v30_v2 = vld [vmem:[%s529_s0 + $0x8] sm:$0x1f]  ;;  %vm72_vm0 = vcmask 1044480   ;;  %vm415_vm1 = vmmov 1   ;;  %vm59_vm3 = vcmask 105472  }
   0x4   :  { %v366_v3 = vpack.c.bf16 %v30_v2, %v29_v1  ;;  %vm367_vm2 = vmpackc.low %vm72_vm0, %vm415_vm1  ;;  %v31_v4 = vld [vmem:[%s530_s1] sm:$0xff]  ;;  %v416_v5 = vmov 0   ;;  %v37_v7 = vld [vmem:[%s531_s2 + $0x10] sm:$0xff] }
   0x5   :  { %349 = vmatprep.mubr.msk.f32.mxu0 %vm59_vm3, %v31_v4  ;;  %385 = vset.pattern.permute.xlu0 %v416_v5  ;;  %v35_v6 = vld [vmem:[%s531_s2] sm:$0xff]  ;;  %v32_v8 = vld [vmem:[%s530_s1 + $0x8] sm:$0xff]  ;;  %v33_v9 = vld [vmem:[%s530_s1 + $0x10] sm:$0xff] }
   0x6   :  { %368 = vmatprep.subr.msk.bf16.mxu0 %vm367_vm2, %v366_v3  ;;  %386 = vset.pattern.permute.xlu1 %v416_v5  ;;  %v36_v10 = vld [vmem:[%s531_s2 + $0x8] sm:$0xff]  ;;  %v38_v11 = vld [vmem:[%s531_s2 + $0x18] sm:$0x3f] }
   0x7   :  { %371 = vmatpush3.bf16.msk.msra.mxu0 %vm367_vm2, %v366_v3  ;;  %41 = vperm.xlu0 %385, %v35_v6  }
   0x8   :  { %51 = vperm.xlu1 %386, %v37_v7  }
   0x9   :  { %14 = vsyncpa [#allocation4], 0  ;;  %v34_v12 = vld [vmem:[%s530_s1 + $0x18] sm:$0x3f]  ;;  %v171_v13 = vld [vmem:[%s533_s4] sm:$0xff]  ;;  %vm183_vm4 = vcmask 244736   ;;  %v300_v56 = vlaneseq }
   0xa   :  { %350 = vmatmul.mubr.msk.f32.vlgmr.msra.gmra.mrb[0].mxu0 %vm59_vm3, %v32_v8  ;;  %v172_v14 = vld [vmem:[%s533_s4 + $0x8] sm:$0xff]  ;;  %v273_v15 = vld [vmem:[%s534_s5] sm:$0xff]  ;;  %vm190_vm5 = vcmask 1045504  }
   0xb   :  { %352 = vmatprep.mubr.msk.f32.mxu0 %vm59_vm3, %v33_v9  ;;  %46 = vperm.xlu0 %385, %v36_v10   ;;  %v274_v16 = vld [vmem:[%s534_s5 + $0x8] sm:$0xff]  ;;  %v294_v17 = vld [vmem:[#allocation2] sm:$0x1]  ;;  %vm377_vm6 = vmpackc.low %vm190_vm5, %vm415_vm1  ;;  %v301_v59 = vshrl.u32 %v300_v56, 7 }
   0xc   :  { %56 = vperm.xlu1 %386, %v38_v11   ;;  %v169_v18 = vld [vmem:[%s532_s3] sm:$0xff]  ;;  %v170_v41 = vld [vmem:[%s532_s3 + $0x8] sm:$0xff]  ;;  %s417_s3 = smov [#allocation3]  }
   0xd   :  { %363 = vmatprep.mubr.msk.f32.mxu1 %vm183_vm4, %v169_v18  ;;  %v302_v62 = vsub.s32 0, %v301_v59  ;;  %s317_s29 = sshll.u32 %s417_s3, 4  ;;  %s318_s29 = int_to_ptr.vmem [resolvable:$true] %s317_s29 }
   0xe   :  { %353 = vmatmul.mubr.msk.f32.gmra.mrb[2].mxu0 %vm59_vm3, %v34_v12  ;;  %s391_s30 = scalar_lea.vmem %s318_s29, 16  ;;  %s395_s8 = scalar_lea.vmem %s318_s29, 32 }
   0xf   :  { %175 = vperm.xlu0 %385, %v171_v13   ;;  %p392_p0 = scmp.ne.s32.totalorder %s318_s29, %s391_s30  ;;  %p396_p1 = scmp.lt.s32.totalorder %s318_s29, %s318_s29 }
  0x10   :  { %180 = vperm.xlu1 %386, %v172_v14   ;;  %p397_p2 = scmp.lt.s32.totalorder %s395_s8, %s391_s30 }
  0x12   :  { %p398_p3 = por %p397_p2, %p396_p1 }
  0x13   :  { %277 = vperm.xlu0 %385, %v273_v15  }
  0x14   :  { %282 = vperm.xlu1 %386, %v274_v16   ;;  %p399_p4 = pnand %p398_p3, %p392_p0 }
  0x17   :  { %297 = vperm.xlu0 %385, %v294_v17  }
  0x86   :  { %v42_v19 = vpop.permute.xlu0 %41 }
  0x87   :  { %v52_v20 = vpop.permute.xlu1 %51 }
  0x8a   :  { %v47_v21 = vpop.permute.xlu0 %46 }
  0x8b   :  { %v57_v27 = vpop.permute.xlu1 %56 }
  0x8e   :  { %v176_v44 = vpop.permute.xlu0 %175 }
  0x8f   :  { %v181_v42 = vpop.permute.xlu1 %180 }
  0x92   :  { %v278_v53 = vpop.permute.xlu0 %277 }
  0x93   :  { %v283_v51 = vpop.permute.xlu1 %282 }
  0x96   :  { %v298_v0 = vpop.permute.xlu0 %297 }
  0x97   :  { %v303_v2 = vrot.slane %v298_v0, %v302_v62 }
  0xdd   :  { %v351_v22 = vpop.f32.mrb[0].mxu0 }
  0xde   :  { %v148_v23 = vadd.f32 %v351_v22, %v47_v21  ;;  %v142_v24 = vpop.f32.mrb[1].mxu0 }
  0xdf   :  { %v143_v25 = vadd.f32 %v142_v24, %v42_v19 }
  0xe0   :  { %v162_v26 = vmax.f32 %v148_v23, 0.0 }
  0xe1   :  { %v161_v28 = vmax.f32 %v143_v25, 0.0  ;;  %v354_v29 = vpop.f32.mrb[2].mxu0 }
  0xe2   :  { %v166_v30 = vmul.f32 %v162_v26, %v148_v23  ;;  %v158_v31 = vadd.f32 %v354_v29, %v57_v27  ;;  %v152_v32 = vpop.f32.mrb[3].mxu0 }
  0xe3   :  { %v165_v33 = vmul.f32 %v161_v28, %v143_v25  ;;  %v153_v34 = vadd.f32 %v152_v32, %v52_v20 }
  0xe4   :  { %v164_v35 = vmax.f32 %v158_v31, 0.0 }
  0xe5   :  { %v163_v36 = vmax.f32 %v153_v34, 0.0  ;;  %v372_v37 = vpack.c.bf16 %v166_v30, %v165_v33 }
  0xe6   :  { %v168_v38 = vmul.f32 %v164_v35, %v158_v31 }
  0xe7   :  { %v167_v39 = vmul.f32 %v163_v36, %v153_v34  ;;  %373 = vmatprep.subr.bf16.mxu1 %v372_v37 }
  0xe8   :  { %375 = vmatpush3.bf16.msra.mxu1 %v372_v37 }
  0xe9   :  { %v376_v40 = vpack.c.bf16 %v168_v38, %v167_v39 }
  0xeb   :  { %378 = vmatprep.subr.msk.bf16.mxu1 %vm377_vm6, %v376_v40 }
  0xec   :  { %381 = vmatpush3.bf16.msk.msra.mxu1 %vm377_vm6, %v376_v40 }
  0xef   :  { %364 = vmatmul.mubr.msk.f32.vlgmr.msra.gmra.mrb[0].mxu1 %vm183_vm4, %v170_v41 }
 0x1c2   :  { %v365_v43 = vpop.f32.mrb[0].mxu1 }
 0x1c3   :  { %v266_v45 = vadd.f32 %v365_v43, %v181_v42  ;;  %v260_v46 = vpop.f32.mrb[1].mxu1 }
 0x1c4   :  { %v261_v47 = vadd.f32 %v260_v46, %v176_v44 }
 0x1c5   :  { %v270_v48 = vmax.f32 %v266_v45, 0.0 }
 0x1c6   :  { %v269_v49 = vmax.f32 %v261_v47, 0.0 }
 0x1c7   :  { %v272_v50 = vmul.f32 %v270_v48, %v266_v45 }
 0x1c8   :  { %v271_v52 = vmul.f32 %v269_v49, %v261_v47 }
 0x1c9   :  { %v286_v54 = vmul.f32 %v283_v51, %v272_v50 }
 0x1ca   :  { %v285_v55 = vmul.f32 %v278_v53, %v271_v52 }
 0x1cc   :  { %v287_v57 = vadd.f32 %v286_v54, %v285_v55 }
 0x1ce   :  { %v288_v58 = vrot.slane %v287_v57, 4 }
 0x1d0   :  { %v289_v60 = vadd.f32 %v288_v58, %v287_v57 }
 0x1d2   :  { %v290_v61 = vrot.slane %v289_v60, 2 }
 0x1d4   :  { %v291_v63 = vadd.f32 %v290_v61, %v289_v60 }
 0x1d6   :  { %v292_v1 = vrot.slane %v291_v63, 1 }
 0x1d8   :  { %v293_v3 = vadd.f32 %v292_v1, %v291_v63 }
 0x1da   :  { %v304_v4 = vadd.f32 %v303_v2, %v293_v3 }
 0x1dc   :  { %v305_v5 = vsub.f32 0.0, %v304_v4 }
 0x1de   :  { %v306_v6 = vmul.f32 1.442695, %v305_v5 }
 0x1e0   :  { %387 = vpow2.f32 %v306_v6 }
 0x1ea   :  { %v388_v7 = vpop.eup %387 }
 0x1eb   :  { %v308_v8 = vadd.f32 1.0, %v388_v7 }
 0x1ed   :  { %389 = vrcp.f32 %v308_v8 }
 0x1f7   :  { %v390_v9 = vpop.eup %389 }
 0x1f8   :  { %310 = vst [vmem:[#allocation3] sm:$0x1] %v390_v9 }
 0x1f9   :  { %402 = shalt.err (!%p399_p4)
}
 0x1fa   :  { %s403_s0 = scalar_lea.hbm %s536_s7, 16 }
 0x1fb   :  { %p404_p5 = scmp.ne.s32.totalorder %s536_s7, %s403_s0  ;;  %p407_p6 = scmp.lt.u32.totalorder %s403_s0, %s536_s7 }
 0x1fd   :  { %p409_p7 = pnand %p407_p6, %p404_p5 }
 0x1ff   :  { %412 = shalt.err (!%p409_p7)
}
 0x200   :  { %320 = dma.vmem_to_hbm [thread:$0]  %s318_s29, 16, %s536_s7, [#allocation4]  }
 0x201   :  { %413 = dma.done.wait [#allocation4], 16  }
 0x202   :  { %414 = vsyncadd [#allocation4], 4294967280 }
 0x203   :  { %324 = vsyncpa [#allocation4], 1 }

</bundles_post_ra>
